<compile_context>
chip_gen: v6e
topology: v6e:2x2x1
jax: 0.10.0
libtpu: 0.0.40
codegen_flags: <defaults>
</compile_context>

<pallas_src>
import math

import jax
import jax.numpy as jnp
from jax import lax
from jax.experimental import pallas as pl
from jax.experimental.pallas import tpu as pltpu

_EPS = 1e-8


def _feature_kernel(x_ref, fcw_ref, fcb_ref, feat_ref):
    # x:   [B, D_in]
    # fcw: [D_out, D_in]  (native nn.Linear layout, NOT pre-transposed)
    # fcb: [1, D_out]
    x = x_ref[...].astype(jnp.float32)
    # trans_b contraction on the MXU: y = x @ fcw.T without materializing fcw.T
    y = lax.dot_general(
        x, fcw_ref[...].astype(jnp.float32),
        dimension_numbers=(((1,), (1,)), ((), ())),
        preferred_element_type=jnp.float32)
    y = y + fcb_ref[...].astype(jnp.float32)

    # Row-wise L2 normalization: 1/max(||y||, eps) == rsqrt(max(sum(y^2), eps^2))
    sumsq = jnp.sum(y * y, axis=1, keepdims=True)
    inv = lax.rsqrt(jnp.maximum(sumsq, _EPS * _EPS))      # EUP, not VALU sqrt+div
    feat_ref[...] = (y * inv).astype(feat_ref.dtype)


def _logits_kernel(feat_ref, w_ref, scale_ref, logits_ref):
    # feat:  [B, D]      (same block for every C tile)
    # w:     [D, TN]     column block of the class-weight matrix
    # scale: SMEM f32[1] scalar
    w = w_ref[...].astype(jnp.float32)

    # Column-wise L2 normalization of this tile's columns (independent per tile).
    sumsq = jnp.sum(w * w, axis=0, keepdims=True)          # [1, TN]
    inv = lax.rsqrt(jnp.maximum(sumsq, _EPS * _EPS))        # == 1/max(colnorm, eps)
    # Fold the scalar scale into the per-column inverse norm: one multiply pass,
    # no post-matmul [B, TN] scaling.
    w_ns = w * (inv * scale_ref[0])

    logits_ref[...] = jnp.dot(
        feat_ref[...], w_ns, preferred_element_type=jnp.float32
    ).astype(logits_ref.dtype)


@jax.jit
def cosine_softmax(x, fc_weight, fc_bias, class_weights, scale):
    """x: [B, D]; fc_weight: [D, D] (PyTorch out x in layout); fc_bias: [D];
    class_weights: [D, C]; scale: scalar. Returns (features [B,D], logits [B,C])."""
    B, D = x.shape
    C = class_weights.shape[1]

    fcb = fc_bias.reshape(1, D).astype(jnp.float32)
    scale1 = jnp.reshape(scale, (1,)).astype(jnp.float32)

    # ---- features = normalize(x @ fc_w.T + fc_b), single invocation ----------
    feat = pl.pallas_call(
        _feature_kernel,
        out_shape=jax.ShapeDtypeStruct((B, D), jnp.float32),
        in_specs=[
            pl.BlockSpec(memory_space=pltpu.MemorySpace.VMEM),
            pl.BlockSpec(memory_space=pltpu.MemorySpace.VMEM),
            pl.BlockSpec(memory_space=pltpu.MemorySpace.VMEM),
        ],
        out_specs=pl.BlockSpec(memory_space=pltpu.MemorySpace.VMEM),
    )(x.astype(jnp.float32), fc_weight.astype(jnp.float32), fcb)

    # ---- logits = scale * feat @ normalize(W, axis=0), tiled over C ----------
    tn = 128 if C % 128 == 0 else C
    grid = (C // tn,)
    logits = pl.pallas_call(
        _logits_kernel,
        out_shape=jax.ShapeDtypeStruct((B, C), jnp.float32),
        grid=grid,
        in_specs=[
            pl.BlockSpec((B, D), lambda j: (0, 0)),
            pl.BlockSpec((D, tn), lambda j: (0, j)),
            pl.BlockSpec(memory_space=pltpu.MemorySpace.SMEM),
        ],
        out_specs=pl.BlockSpec((B, tn), lambda j: (0, j)),
        compiler_params=pltpu.CompilerParams(
            dimension_semantics=("parallel",)),
    )(feat, class_weights.astype(jnp.float32), scale1)

    return feat, logits


def _reference(x, fc_weight, fc_bias, class_weights, scale):
    eps = 1e-8
    y = x @ fc_weight.T + fc_bias
    feat = y / jnp.maximum(jnp.linalg.norm(y, axis=1, keepdims=True), eps)
    wn = class_weights / jnp.maximum(
        jnp.linalg.norm(class_weights, axis=0, keepdims=True), eps)
    return feat, scale * (feat @ wn)


if __name__ == "__main__":
    # Small shapes consistent with the module: B pooled feature vectors of
    # dim D (backbone in_channels stand-in), C classes for the cosine head.
    B, D, C = 8, 128, 256

    key = jax.random.PRNGKey(0)
    k_x, k_w, k_s, k_fw, k_fb = jax.random.split(key, 5)

    # Pooled backbone features (stand-in for the timm backbone output).
    x = jax.random.normal(k_x, (B, D), dtype=jnp.float32)

    # CosineSoftmaxModule params, initialized like __init__:
    xav_bound = math.sqrt(6.0 / (D + C))                       # xavier_uniform
    class_weights = jax.random.uniform(k_w, (D, C), jnp.float32,
                                       minval=-xav_bound, maxval=xav_bound)
    scale = jax.nn.softplus(jax.random.normal(k_s, ()))        # softplus(randn())
    lin_bound = 1.0 / math.sqrt(D)                             # nn.Linear init
    fc_weight = jax.random.uniform(k_fw, (D, D), jnp.float32,
                                   minval=-lin_bound, maxval=lin_bound)
    fc_bias = jax.random.uniform(k_fb, (D,), jnp.float32,
                                 minval=-lin_bound, maxval=lin_bound)

    feat, logits = cosine_softmax(x, fc_weight, fc_bias, class_weights, scale)
    jax.block_until_ready((feat, logits))

    # Correctness check against a pure-JAX reference.
    feat_ref, logits_ref = _reference(x, fc_weight, fc_bias, class_weights, scale)
    assert jnp.allclose(feat, feat_ref, atol=1e-5, rtol=1e-5)
    assert jnp.allclose(logits, logits_ref, atol=1e-4, rtol=1e-4)

    print("KERNEL_OK")
</pallas_src>

<mosaic_0001>
module attributes {stable_mosaic.version = 11 : i64} {
  func.func @_feature_kernel(%arg0: memref<8x128xf32, #tpu.memory_space<vmem>>, %arg1: memref<128x128xf32, #tpu.memory_space<vmem>>, %arg2: memref<1x128xf32, #tpu.memory_space<vmem>>, %arg3: memref<8x128xf32, #tpu.memory_space<vmem>>) attributes {dimension_semantics = [], scalar_prefetch = 0 : i64, scratch_operands = 0 : i64, tpu.core_type = #tpu.core_type<tc>} {
    %c0 = arith.constant 0 : index
    %c0_0 = arith.constant 0 : index
    %0 = vector.load %arg0[%c0, %c0_0] : memref<8x128xf32, #tpu.memory_space<vmem>>, vector<8x128xf32>
    %c0_1 = arith.constant 0 : index
    %c0_2 = arith.constant 0 : index
    %1 = vector.load %arg1[%c0_1, %c0_2] : memref<128x128xf32, #tpu.memory_space<vmem>>, vector<128x128xf32>
    %cst = arith.constant dense<0.000000e+00> : vector<8x128xf32>
    %2 = tpu.matmul %0, %1, %cst {dimension_numbers = #tpu.dot_dimension_numbers<[1], [1], [0], [0], [0, 0, 1, 0], [], []>} : vector<8x128xf32>, vector<128x128xf32>, vector<8x128xf32> -> vector<8x128xf32>
    %c0_3 = arith.constant 0 : index
    %c0_4 = arith.constant 0 : index
    %3 = vector.load %arg2[%c0_3, %c0_4] : memref<1x128xf32, #tpu.memory_space<vmem>>, vector<1x128xf32>
    %4 = vector.broadcast %3 : vector<1x128xf32> to vector<8x128xf32>
    %5 = arith.addf %2, %4 : vector<8x128xf32>
    %6 = arith.mulf %5, %5 : vector<8x128xf32>
    %cst_5 = arith.constant dense<0.000000e+00> : vector<8xf32>
    %7 = vector.multi_reduction <add>, %6, %cst_5 [1] : vector<8x128xf32> to vector<8xf32>
    %8 = vector.shape_cast %7 : vector<8xf32> to vector<8x1xf32>
    %cst_6 = arith.constant 1.000000e-16 : f32
    %9 = vector.broadcast %cst_6 : f32 to vector<8x1xf32>
    %10 = arith.maximumf %8, %9 : vector<8x1xf32>
    %11 = math.rsqrt %10 : vector<8x1xf32>
    %12 = vector.broadcast %11 : vector<8x1xf32> to vector<8x128xf32>
    %13 = arith.mulf %5, %12 : vector<8x128xf32>
    %c0_7 = arith.constant 0 : index
    %c0_8 = arith.constant 0 : index
    %14 = vector.load %arg3[%c0_7, %c0_8] : memref<8x128xf32, #tpu.memory_space<vmem>>, vector<8x128xf32>
    tpu.vector_store %arg3[%c0_7, %c0_8], %13 {strides = array<i32>} : memref<8x128xf32, #tpu.memory_space<vmem>>, vector<8x128xf32>,
    return
  }
}

module attributes {stable_mosaic.version = 11 : i64} {
  func.func @_logits_kernel(%arg0: i32, %arg1: memref<8x128xf32, #tpu.memory_space<vmem>>, %arg2: memref<128x128xf32, #tpu.memory_space<vmem>>, %arg3: memref<1xf32, #tpu.memory_space<smem>>, %arg4: memref<8x128xf32, #tpu.memory_space<vmem>>) attributes {dimension_semantics = [#tpu.dimension_semantics<parallel>], iteration_bounds = array<i64: 2>, scalar_prefetch = 0 : i64, scratch_operands = 0 : i64, tpu.core_type = #tpu.core_type<tc>, window_params = [{pipeline_mode = #tpu.pipeline_mode<synchronous>, transform_indices = @transform_0, window_bounds = array<i64: 8, 128>}, {transform_indices = @transform_1, window_bounds = array<i64: 128, 128>}, {transform_indices = @transform_2, window_bounds = array<i64: 1>}, {transform_indices = @transform_3, window_bounds = array<i64: 8, 128>}]} {
    %c0 = arith.constant 0 : index
    %c0_0 = arith.constant 0 : index
    %0 = vector.load %arg2[%c0, %c0_0] : memref<128x128xf32, #tpu.memory_space<vmem>>, vector<128x128xf32>
    %1 = arith.mulf %0, %0 : vector<128x128xf32>
    %cst = arith.constant dense<0.000000e+00> : vector<128xf32>
    %2 = vector.multi_reduction <add>, %1, %cst [0] : vector<128x128xf32> to vector<128xf32>
    %3 = vector.shape_cast %2 : vector<128xf32> to vector<1x128xf32>
    %cst_1 = arith.constant 1.000000e-16 : f32
    %4 = vector.broadcast %cst_1 : f32 to vector<1x128xf32>
    %5 = arith.maximumf %3, %4 : vector<1x128xf32>
    %6 = math.rsqrt %5 : vector<1x128xf32>
    %c0_2 = arith.constant 0 : index
    %7 = memref.load %arg3[%c0_2] : memref<1xf32, #tpu.memory_space<smem>>
    %8 = vector.broadcast %7 : f32 to vector<1x128xf32>
    %9 = arith.mulf %6, %8 : vector<1x128xf32>
    %10 = vector.broadcast %9 : vector<1x128xf32> to vector<128x128xf32>
    %11 = arith.mulf %0, %10 : vector<128x128xf32>
    %c0_3 = arith.constant 0 : index
    %c0_4 = arith.constant 0 : index
    %12 = vector.load %arg1[%c0_3, %c0_4] : memref<8x128xf32, #tpu.memory_space<vmem>>, vector<8x128xf32>
    %cst_5 = arith.constant dense<0.000000e+00> : vector<8x128xf32>
    %13 = tpu.matmul %12, %11, %cst_5 {dimension_numbers = #tpu.dot_dimension_numbers<[1], [0], [0], [1], [0, 0, 1, 1], [], []>} : vector<8x128xf32>, vector<128x128xf32>, vector<8x128xf32> -> vector<8x128xf32>
    %c0_6 = arith.constant 0 : index
    %c0_7 = arith.constant 0 : index
    %14 = vector.load %arg4[%c0_6, %c0_7] : memref<8x128xf32, #tpu.memory_space<vmem>>, vector<8x128xf32>
    tpu.vector_store %arg4[%c0_6, %c0_7], %13 {strides = array<i32>} : memref<8x128xf32, #tpu.memory_space<vmem>>, vector<8x128xf32>,
    return
  }
  func.func @transform_0(%arg0: i32) -> (i32, i32) {
    %c0_i32 = arith.constant 0 : i32
    %c0_i32_0 = arith.constant 0 : i32
    %c0_i32_1 = arith.constant 0 : i32
    return %c0_i32, %c0_i32_0 : i32, i32
  }
  func.func @transform_1(%arg0: i32) -> (i32, i32) {
    %c0_i32 = arith.constant 0 : i32
    %c0_i32_0 = arith.constant 0 : i32
    return %c0_i32, %arg0 : i32, i32
  }
  func.func @transform_2(%arg0: i32) -> i32 {
    %c0_i32 = arith.constant 0 : i32
    %c0_i32_0 = arith.constant 0 : i32
    return %c0_i32 : i32
  }
  func.func @transform_3(%arg0: i32) -> (i32, i32) {
    %c0_i32 = arith.constant 0 : i32
    %c0_i32_0 = arith.constant 0 : i32
    return %c0_i32, %arg0 : i32, i32
  }
}

</mosaic_0001>

<bundles_post_ra>
// kernel: cosine_softmax.2
= control target key start
LH: loop header
LB: loop body
LE: loop exit
PB: predicated region body
PF: predicated region fallthrough
CT: control target
= control target key end

     0   :  { %8 = vsyncpa [#allocation3], 0  ;;  %s290_s0 = inlined_call_operand.hbm [shape: f32[8,128], index: 0, kind: input, shape index: {}]   ;;  %s291_s1 = inlined_call_operand.hbm [shape: f32[128,128], index: 1, kind: input, shape index: {}]   ;;  %s292_s2 = inlined_call_operand.vmem [shape: f32[1,128], index: 2, kind: input, shape index: {}]   ;;  %s293_s3 = inlined_call_operand.vmem [shape: f32[8,128], index: 3, kind: output, shape index: {}]  }
   0x1   :  { %9 = vsyncpa [#allocation5], 0  ;;  %s252_s12 = smov [#allocation2]   ;;  %s253_s14 = smov [#allocation4]  }
   0x2   :  { %s16_s13 = sshll.u32 %s252_s12, 4  ;;  %s25_s15 = sshll.u32 %s253_s14, 4  ;;  %s17_s13 = int_to_ptr.vmem [resolvable:$true] %s16_s13  ;;  %s26_s15 = int_to_ptr.vmem [resolvable:$true] %s25_s15 }
   0x3   :  { %s216_s16 = scalar_lea.vmem %s17_s13, 128  ;;  %p221_p1 = scmp.lt.s32.totalorder %s17_s13, %s17_s13 }
   0x4   :  { %p217_p0 = scmp.ne.s32.totalorder %s17_s13, %s216_s16  ;;  %p222_p2 = scmp.lt.s32.totalorder %s216_s16, %s216_s16 }
   0x6   :  { %p223_p3 = por %p222_p2, %p221_p1 }
   0x8   :  { %p224_p4 = pnand %p223_p3, %p217_p0 }
   0xa   :  { %227 = shalt.err (!%p224_p4)
}
   0xb   :  { %19 = dma.hbm_to_vmem [thread:$0]  %s290_s0, 128, %s17_s13, [#allocation3]  }
   0xc   :  { %s236_s19 = scalar_lea.vmem %s26_s15, 2048  ;;  %p241_p6 = scmp.lt.s32.totalorder %s26_s15, %s26_s15 }
   0xd   :  { %p237_p5 = scmp.ne.s32.totalorder %s26_s15, %s236_s19  ;;  %p242_p7 = scmp.lt.s32.totalorder %s236_s19, %s236_s19 }
   0xf   :  { %p243_p8 = por %p242_p7, %p241_p6 }
  0x11   :  { %p244_p9 = pnand %p243_p8, %p237_p5 }
  0x13   :  { %247 = shalt.err (!%p244_p9)
}
  0x14   :  { %s254_s20 = smov 128   ;;  %s255_s21 = smov 8  }
  0x15   :  { %31 = dma.hbm_to_vmem [thread:$0]  %s291_s1, 2048, %s26_s15, [#allocation5], %s254_s20, %s254_s20, %s255_s21  }
  0x16   :  { %248 = dma.done.wait [#allocation3], 128  }
  0x17   :  { %249 = vsyncadd [#allocation3], 4294967168 }
  0x18   :  { %250 = dma.done.wait [#allocation5], 2048  }
  0x19   :  { %251 = vsyncadd [#allocation5], 4294965248  ;;  %v256_v0 = vmov 0.0   ;;  %vm257_vm0 = vmmov 0   ;;  %v56_v1 = vld [vmem:[#allocation4 + $0x78] sm:$0xff]  ;;  %v55_v2 = vld [vmem:[#allocation4 + $0x70] sm:$0xff] }
  0x1a   :  { %165 = vmatprep.subr.mxu0 %v256_v0  ;;  %197 = vmatprep.mubr.msk.f32.mxu0 %vm257_vm0, %v256_v0  ;;  %v54_v3 = vld [vmem:[#allocation4 + $0x68] sm:$0xff]  ;;  %v53_v4 = vld [vmem:[#allocation4 + $0x60] sm:$0xff]  ;;  %v52_v5 = vld [vmem:[#allocation4 + $0x58] sm:$0xff] }
  0x1b   :  { %166 = vmatpush3.xpose.msra.mxu0 %v56_v1  ;;  %v51_v6 = vld [vmem:[#allocation4 + $0x50] sm:$0xff]  ;;  %v50_v7 = vld [vmem:[#allocation4 + $0x48] sm:$0xff]  ;;  %v49_v8 = vld [vmem:[#allocation4 + $0x40] sm:$0xff] }
  0x1c   :  { %167 = vmatprep.subr.mxu0 %v256_v0  ;;  %v48_v9 = vld [vmem:[#allocation4 + $0x38] sm:$0xff]  ;;  %v47_v10 = vld [vmem:[#allocation4 + $0x30] sm:$0xff]  ;;  %v46_v11 = vld [vmem:[#allocation4 + $0x28] sm:$0xff] }
  0x1d   :  { %v45_v12 = vld [vmem:[#allocation4 + $0x20] sm:$0xff]  ;;  %v44_v13 = vld [vmem:[#allocation4 + $0x18] sm:$0xff]  ;;  %v43_v14 = vld [vmem:[#allocation4 + $0x10] sm:$0xff] }
  0x1e   :  { %v42_v15 = vld [vmem:[#allocation4 + $0x8] sm:$0xff]  ;;  %v41_v16 = vld [vmem:[#allocation4] sm:$0xff]  ;;  %v40_v17 = vld [vmem:[#allocation2] sm:$0xff] }
  0x1f   :  { %168 = vmatpush3.xpose.msra.mxu0 %v55_v2  ;;  %v147_v18 = vld [vmem:[%s292_s2] ss:$0 sm:$0xff] }
  0x20   :  { %169 = vmatprep.subr.mxu0 %v256_v0 }
  0x23   :  { %170 = vmatpush3.xpose.msra.mxu0 %v54_v3 }
  0x24   :  { %171 = vmatprep.subr.mxu0 %v256_v0 }
  0x27   :  { %172 = vmatpush3.xpose.msra.mxu0 %v53_v4 }
  0x28   :  { %173 = vmatprep.subr.mxu0 %v256_v0 }
  0x2b   :  { %174 = vmatpush3.xpose.msra.mxu0 %v52_v5 }
  0x2c   :  { %175 = vmatprep.subr.mxu0 %v256_v0 }
  0x2f   :  { %176 = vmatpush3.xpose.msra.mxu0 %v51_v6 }
  0x30   :  { %177 = vmatprep.subr.mxu0 %v256_v0 }
  0x33   :  { %178 = vmatpush3.xpose.msra.mxu0 %v50_v7 }
  0x34   :  { %179 = vmatprep.subr.mxu0 %v256_v0 }
  0x37   :  { %180 = vmatpush3.xpose.msra.mxu0 %v49_v8 }
  0x38   :  { %181 = vmatprep.subr.mxu0 %v256_v0 }
  0x3b   :  { %182 = vmatpush3.xpose.msra.mxu0 %v48_v9 }
  0x3c   :  { %183 = vmatprep.subr.mxu0 %v256_v0 }
  0x3f   :  { %184 = vmatpush3.xpose.msra.mxu0 %v47_v10 }
  0x40   :  { %185 = vmatprep.subr.mxu0 %v256_v0 }
  0x43   :  { %186 = vmatpush3.xpose.msra.mxu0 %v46_v11 }
  0x44   :  { %187 = vmatprep.subr.mxu0 %v256_v0 }
  0x47   :  { %188 = vmatpush3.xpose.msra.mxu0 %v45_v12 }
  0x48   :  { %189 = vmatprep.subr.mxu0 %v256_v0 }
  0x4b   :  { %190 = vmatpush3.xpose.msra.mxu0 %v44_v13 }
  0x4c   :  { %191 = vmatprep.subr.mxu0 %v256_v0 }
  0x4f   :  { %192 = vmatpush3.xpose.msra.mxu0 %v43_v14 }
  0x50   :  { %193 = vmatprep.subr.mxu0 %v256_v0 }
  0x53   :  { %194 = vmatpush3.xpose.msra.mxu0 %v42_v15 }
  0x54   :  { %195 = vmatprep.subr.mxu0 %v256_v0 }
  0x57   :  { %196 = vmatpush3.xpose.msra.mxu0 %v41_v16 }
  0x5a   :  { %198 = vmatmul.mubr.f32.vlgmr.msra.gmra.mxu0 %v40_v17 }
 0x11a   :  { %v130_v19 = vpop.f32.mrf.mxu0 }
 0x11b   :  { %v131_v20 = vadd.f32 %v147_v18, %v130_v19 }
 0x11c   :  { %v199_v21 = vpop.f32.mrf.mxu0 }
 0x11d   :  { %v134_v22 = vmul.f32 %v131_v20, %v131_v20 }
 0x11f   :  { %135 = vadd.xlane.f32.xlu0 %v134_v22 }
 0x1a8   :  { %v136_v23 = vpop.xlane.xlu0 %135 }
 0x1a9   :  { %v137_v24 = vmax.f32 %v136_v23, 1e-16 }
 0x1ab   :  { %206 = vrsqrt.f32 %v137_v24 }
 0x1b8   :  { %v207_v25 = vpop.eup %206 }
 0x1b9   :  { %v139_v26 = vmul.f32 %v207_v25, %v131_v20 }
 0x1bb   :  { %140 = vst [vmem:[%s293_s3] sm:$0xff] %v139_v26 }
 0x1bc   :  { %145 = vsyncpa [#allocation3], 1 }
 0x1bd   :  { %146 = vsyncpa [#allocation5], 1 }

// kernel: cosine_softmax.3
= control target key start
LH: loop header
LB: loop body
LE: loop exit
PB: predicated region body
PF: predicated region fallthrough
CT: control target
= control target key end

     0   :  { %s893_s0 = inlined_call_operand.vmem [shape: f32[8,128], index: 0, kind: input, shape index: {}]   ;;  %s894_s1 = inlined_call_operand.hbm [shape: f32[128,256], index: 1, kind: input, shape index: {}]   ;;  %s895_s2 = inlined_call_operand.<no memory space> [shape: f32[1], index: 2, kind: input, shape index: {}]   ;;  %s896_s3 = inlined_call_operand.hbm [shape: f32[8,256], index: 3, kind: output, shape index: {}]  }
   0x1   :  { %8 = sst [smem:[#allocation2]] %s895_s2 }
   0x2   :  { %9 = vsyncpa [#allocation4], 0 }
   0x3   :  { %11 = vsyncpa [#allocation4 + $0x1], 0 }
   0x4   :  { %12 = vsyncpa [#allocation5], 0 }
   0x5   :  { %14 = vsyncpa [#allocation5 + $0x1], 0  ;;  %s660_s14 = smov 0   ;;  %s662_s15 = smov 0  }
   0x6   :  { %s664_s16 = smov 0   ;;  %s666_s17 = smov 0  }
   0x7 LB: > { %s681_s2 = sadd.s32 4294967295, %s628_s17   ;;  %s419_s18 = sadd.s32 4294967294, %s628_s17   ;;  %s628_s17 = sphi %s666_s17, %s912_s17   ;;  %s624_s16 = sphi %s664_s16, %s911_s16   ;;  %s620_s15 = sphi %s662_s15, %s910_s15   ;;  %s616_s14 = sphi %s660_s14, %s909_s14  }
   0x8   : > { %s685_s19 = sadd.s32 1, %s628_s17   ;;  %s48_s20 = sadd.s32 1, %s624_s16 }
   0x9   : > { %s45_s21 = ssub.s32 %s628_s17, %s685_s19  ;;  %p55_p0 = scmp.ne.s32.totalorder %s624_s16, %s620_s15 }
   0xa   : > { %p46_p1 = scmp.eq.s32.totalorder %s45_s21, 0  ;;  %p56_p2 = scmp.eq.s32.totalorder %s628_s17, 0 }
   0xb   : > { %p61_p3 = scmp.ne.s32.totalorder %s620_s15, %s616_s14  ;;  %p62_p4 = scmp.eq.s32.totalorder %s681_s2, 0 }
   0xc   : > { %s697_s22 = scalar_select %p46_p1, %s624_s16, %s48_s20  }
   0xd   : > { %p699_p5 = por %p56_p2, %p55_p0  ;;  %p703_p6 = por %p62_p4, %p61_p3 }
   0xe   : > { %p106_p7 = scmp.eq.s32.totalorder %s681_s2, 1  ;;  %p112_p8 = scmp.eq.s32.totalorder %s419_s18, 1 }
   0xf   : > { %s900_s24 = scalar_select %p703_p6, 1, 0 }
  0x10   : > { %p495_p10 = scmp.lt.s32.totalorder %s628_s17, 2  ;;  %p710_p11 = por %p106_p7, %p55_p0 }
  0x11   : > { %p714_p12 = por %p112_p8, %p61_p3  ;;  %s138_s27 = sand.u32 1, %s624_s16  }
  0x12   : > { %s901_s25 = scalar_select %p710_p11, 1, 0 }
  0x13   : > { %s902_s26 = scalar_select %p714_p12, 1, 0 }
  0x14   : > { %s423_s28 = sshll.u32 %s628_s17, 7  ;;  %s422_s29 = sshll.u32 %s138_s27, 7 }
  0x15   : > { %s723_s5 = scalar_lea.hbm %s894_s1, %s423_s28  ;;  %s142_s6 = scalar_lea.vmem [#allocation3], %s422_s29 }
  0x16   : > { %s148_s7 = sshll.u32 %s142_s6, 4  ;;  %p727_p13 = pnand %p495_p10, %p699_p5  ;;  %s731_s7 = int_to_ptr.vmem [resolvable:$true] %s148_s7 }
  0x17   : > { %s734_s9 = scalar_lea.sflag [#allocation4], %s138_s27  ;;  %s536_s10 = scalar_lea.hbm %s723_s5, 2048 }
  0x18   : > { %p537_p1 = scmp.ne.s32.totalorder %s723_s5, %s536_s10  ;;  %p538_p2 = pneg %p727_p13 }
  0x19   : > { %s541_s13 = scalar_lea.hbm %s894_s1, 4096  ;;  %p542_p5 = scmp.lt.s32.totalorder %s723_s5, %s894_s1 }
  0x1a   : > { %p539_p3 = pnand %p538_p2, %p537_p1  ;;  %p543_p7 = scmp.lt.s32.totalorder %s541_s13, %s536_s10 }
  0x1c   : > { %p540_p4 = pneg %p539_p3  ;;  %p544_p8 = por %p543_p7, %p542_p5 }
  0x1e   : > { %p545_p10 = pnand %p544_p8, %p540_p4 }
  0x20   : > { %548 = shalt.err (!%p545_p10)
}
  0x21   : > { %s549_s21 = scalar_lea.vmem %s731_s7, 2048  ;;  %s630_s23 = smov [#allocation3]  }
  0x22   : > { %p550_p9 = scmp.ne.s32.totalorder %s731_s7, %s549_s21  ;;  %s554_s27 = sshll.u32 %s630_s23, 4  ;;  %s555_s27 = int_to_ptr.vmem [resolvable:$false] %s554_s27 }
  0x23   : > { %s556_s28 = scalar_lea.vmem %s555_s27, 4096  ;;  %p557_p3 = scmp.lt.s32.totalorder %s731_s7, %s555_s27 }
  0x24   : > { %p552_p0 = pnand %p550_p9, %p538_p2  ;;  %p558_p12 = scmp.lt.s32.totalorder %s556_s28, %s549_s21 }
  0x26   : > { %p553_p1 = pneg %p552_p0  ;;  %p559_p11 = por %p558_p12, %p557_p3 }
  0x28   : > { %p560_p6 = pnand %p559_p11, %p553_p1 }
  0x2a   : > { %563 = shalt.err (!%p560_p6)
}
  0x2b   : > { %s631_s29 = smov 256   ;;  %s632_s30 = smov 128  }
  0x2c   : > { %s633_s4 = smov 8   ;;  %p156_p9 = scmp.lt.s32.totalorder %s628_s17, 3 }
  0x2d   : > { %490 = dma.hbm_to_vmem [thread:$0]  (!%p727_p13), %s723_s5, 2048, %s731_s7, %s734_s9, %s631_s29, %s632_s30, %s633_s4  }
  0x2e   : > { %p904_p0 = scmp.ge.s32.totalorder %s628_s17, 1 }
  0x30   : > { %p157_p2 = pnand %p904_p0, %p156_p9 }
  0x31   : > { %s759_s6 = sand.u32 (!%p157_p2), 1, %s620_s15   ;;  %p905_p6 = scmp.ne.s32.totalorder (!%p157_p2), %s900_s24, 0 }
  0x32   : > { %160 = sbr.rel (%p157_p2) target bundleno = 359 (0x167), region = 32  ;;  %s425_s10 = sshll.u32 (!%p157_p2), %s759_s6, 7 }
  0x33   : > { %s163_s11 = scalar_lea.sflag (!%p157_p2), [#allocation4], %s759_s6  ;;  %s763_s12 = scalar_lea.vmem (!%p157_p2), [#allocation3], %s425_s10 }
  0x37   : > { %607 = dma.done.wait (%p905_p6), %s163_s11, 2048  }
  0x38   : > { %609 = vsyncadd (%p905_p6), %s163_s11, 4294965248  ;;  %v634_v0 = vmov 0.0   ;;  %vm635_vm0 = vmmov 0   ;;  %v772_v1 = vld [vmem:[%s763_s12] sm:$0xff]  ;;  %v775_v2 = vld [vmem:[%s763_s12 + $0x8] sm:$0xff]  ;;  %s244_s24 = sld [smem:[#allocation2]] }
  0x39   : > { %448 = vmatprep.subr.mxu0 %v634_v0  ;;  %480 = vmatprep.mubr.msk.f32.mxu0 %vm635_vm0, %v634_v0  ;;  %v778_v3 = vld [vmem:[%s763_s12 + $0x10] sm:$0xff]  ;;  %v781_v4 = vld [vmem:[%s763_s12 + $0x18] sm:$0xff]  ;;  %v205_v5 = vmul.f32 %v772_v1, %v772_v1  ;;  %v206_v6 = vmul.f32 %v775_v2, %v775_v2  ;;  %v790_v8 = vld [vmem:[%s763_s12 + $0x20] sm:$0xff]  ;;  %s426_s8 = sshll.u32 %s759_s6, 3  ;;  %s428_s18 = sshll.u32 %s681_s2, 7 }
  0x3a   : > { %v207_v7 = vmul.f32 %v778_v3, %v778_v3  ;;  %v208_v9 = vmul.f32 %v781_v4, %v781_v4  ;;  %v795_v11 = vld [vmem:[%s763_s12 + $0x28] sm:$0xff]  ;;  %v209_v12 = vmul.f32 %v790_v8, %v790_v8  ;;  %v800_v14 = vld [vmem:[%s763_s12 + $0x30] sm:$0xff]  ;;  %v805_v17 = vld [vmem:[%s763_s12 + $0x38] sm:$0xff]  ;;  %s188_s9 = scalar_lea.vmem [#allocation6], %s426_s8  ;;  %s852_s23 = scalar_lea.hbm %s896_s3, %s428_s18 }
  0x3b   : > { %v221_v10 = vadd.f32 %v206_v6, %v205_v5  ;;  %v210_v15 = vmul.f32 %v795_v11, %v795_v11  ;;  %v211_v18 = vmul.f32 %v800_v14, %v800_v14  ;;  %v197_v20 = vld [vmem:[%s763_s12 + $0x40] sm:$0xff]  ;;  %v212_v21 = vmul.f32 %v805_v17, %v805_v17  ;;  %v198_v23 = vld [vmem:[%s763_s12 + $0x48] sm:$0xff]  ;;  %v199_v26 = vld [vmem:[%s763_s12 + $0x50] sm:$0xff]  ;;  %s349_s13 = sshll.u32 %s188_s9, 4  ;;  %s336_s27 = scalar_lea.sflag [#allocation5], %s759_s6  ;;  %s847_s13 = int_to_ptr.vmem [resolvable:$true] %s349_s13 }
  0x3c   : > { %v213_v24 = vmul.f32 %v197_v20, %v197_v20  ;;  %v214_v27 = vmul.f32 %v198_v23, %v198_v23  ;;  %v200_v29 = vld [vmem:[%s763_s12 + $0x58] sm:$0xff]  ;;  %v215_v30 = vmul.f32 %v199_v26, %v199_v26  ;;  %v201_v32 = vld [vmem:[%s763_s12 + $0x60] sm:$0xff]  ;;  %v202_v35 = vld [vmem:[%s763_s12 + $0x68] sm:$0xff]  ;;  %s564_s28 = scalar_lea.vmem %s847_s13, 128  ;;  %p906_p12 = scmp.ne.s32.totalorder %s901_s25, 0 }
  0x3d   : > { %v222_v13 = vadd.f32 %v221_v10, %v207_v7  ;;  %v216_v33 = vmul.f32 %v200_v29, %v200_v29  ;;  %v217_v36 = vmul.f32 %v201_v32, %v201_v32  ;;  %v203_v38 = vld [vmem:[%s763_s12 + $0x70] sm:$0xff]  ;;  %v218_v39 = vmul.f32 %v202_v35, %v202_v35  ;;  %v204_v41 = vld [vmem:[%s763_s12 + $0x78] sm:$0xff]  ;;  %p565_p11 = scmp.ne.s32.totalorder %s847_s13, %s564_s28  ;;  %s636_s2 = smov [#allocation6]  }
  0x3e   : > { %v219_v42 = vmul.f32 %v203_v38, %v203_v38  ;;  %v220_v44 = vmul.f32 %v204_v41, %v204_v41  ;;  %v245_v55 = vstv %s244_s24  ;;  %s568_s29 = sshll.u32 %s636_s2, 4  ;;  %s569_s29 = int_to_ptr.vmem [resolvable:$false] %s568_s29 }
  0x3f   : > { %v223_v16 = vadd.f32 %v222_v13, %v208_v9  ;;  %p566_p13 = pnand %p565_p11, %p906_p12  ;;  %s570_s30 = scalar_lea.vmem %s569_s29, 256 }
  0x40   : > { %p571_p5 = scmp.lt.s32.totalorder %s847_s13, %s569_s29  ;;  %p572_p7 = scmp.lt.s32.totalorder %s570_s30, %s564_s28 }
  0x41   : > { %v224_v19 = vadd.f32 %v223_v16, %v209_v12  ;;  %p567_p4 = pneg %p566_p13 }
  0x42   : > { %p573_p8 = por %p572_p7, %p571_p5 }
  0x43   : > { %v225_v22 = vadd.f32 %v224_v19, %v210_v15 }
  0x44   : > { %p574_p10 = pnand %p573_p8, %p567_p4 }
  0x45   : > { %v226_v25 = vadd.f32 %v225_v22, %v211_v18 }
  0x47   : > { %v227_v28 = vadd.f32 %v226_v25, %v212_v21 }
  0x49   : > { %v228_v31 = vadd.f32 %v227_v28, %v213_v24 }
  0x4b   : > { %v229_v34 = vadd.f32 %v228_v31, %v214_v27 }
  0x4d   : > { %v230_v37 = vadd.f32 %v229_v34, %v215_v30 }
  0x4f   : > { %v231_v40 = vadd.f32 %v230_v37, %v216_v33 }
  0x51   : > { %v232_v43 = vadd.f32 %v231_v40, %v217_v36 }
  0x53   : > { %v233_v45 = vadd.f32 %v232_v43, %v218_v39 }
  0x55   : > { %v234_v46 = vadd.f32 %v233_v45, %v219_v42 }
  0x57   : > { %v235_v47 = vadd.f32 %v234_v46, %v220_v44 }
  0x59   : > { %v236_v48 = vrot.slane %v235_v47, 4 }
  0x5b   : > { %v237_v49 = vadd.f32 %v236_v48, %v235_v47 }
  0x5d   : > { %v238_v50 = vrot.slane %v237_v49, 2 }
  0x5f   : > { %v239_v51 = vadd.f32 %v238_v50, %v237_v49 }
  0x61   : > { %v240_v52 = vrot.slane %v239_v51, 1 }
  0x63   : > { %v241_v53 = vadd.f32 %v240_v52, %v239_v51 }
  0x65   : > { %v242_v54 = vmax.f32 %v241_v53, 1e-16 }
  0x67   : > { %534 = vrsqrt.f32 %v242_v54 }
  0x74   : > { %v535_v56 = vpop.eup %534 }
  0x75   : > { %v246_v57 = vmul.f32 %v535_v56, %v245_v55 }
  0x77   : > { %v262_v58 = vmul.f32 %v246_v57, %v204_v41  ;;  %v261_v59 = vmul.f32 %v246_v57, %v203_v38  ;;  %v260_v60 = vmul.f32 %v246_v57, %v202_v35  ;;  %v259_v61 = vmul.f32 %v246_v57, %v201_v32 }
  0x78   : > { %v258_v62 = vmul.f32 %v246_v57, %v200_v29  ;;  %v257_v63 = vmul.f32 %v246_v57, %v199_v26  ;;  %v256_v5 = vmul.f32 %v246_v57, %v198_v23  ;;  %v255_v6 = vmul.f32 %v246_v57, %v197_v20 }
  0x79   : > { %449 = vmatpush3.msra.mxu0 %v262_v58  ;;  %v254_v7 = vmul.f32 %v246_v57, %v805_v17  ;;  %v253_v9 = vmul.f32 %v246_v57, %v800_v14  ;;  %v252_v10 = vmul.f32 %v246_v57, %v795_v11  ;;  %v251_v12 = vmul.f32 %v246_v57, %v790_v8 }
  0x7a   : > { %450 = vmatprep.subr.mxu0 %v634_v0  ;;  %v250_v13 = vmul.f32 %v246_v57, %v781_v4  ;;  %v249_v14 = vmul.f32 %v246_v57, %v778_v3  ;;  %v248_v11 = vmul.f32 %v246_v57, %v775_v2  ;;  %v247_v8 = vmul.f32 %v246_v57, %v772_v1  ;;  %v263_v4 = vld [vmem:[%s893_s0] sm:$0xff] }
  0x7b   : > { %451 = vmatpush3.msra.mxu0 %v261_v59 }
  0x7c   : > { %452 = vmatprep.subr.mxu0 %v634_v0 }
  0x7d   : > { %453 = vmatpush3.msra.mxu0 %v260_v60 }
  0x7e   : > { %454 = vmatprep.subr.mxu0 %v634_v0 }
  0x7f   : > { %455 = vmatpush3.msra.mxu0 %v259_v61 }
  0x80   : > { %456 = vmatprep.subr.mxu0 %v634_v0 }
  0x81   : > { %457 = vmatpush3.msra.mxu0 %v258_v62 }
  0x82   : > { %458 = vmatprep.subr.mxu0 %v634_v0 }
  0x83   : > { %459 = vmatpush3.msra.mxu0 %v257_v63 }
  0x84   : > { %460 = vmatprep.subr.mxu0 %v634_v0 }
  0x85   : > { %461 = vmatpush3.msra.mxu0 %v256_v5 }
  0x86   : > { %462 = vmatprep.subr.mxu0 %v634_v0 }
  0x87   : > { %463 = vmatpush3.msra.mxu0 %v255_v6 }
  0x88   : > { %464 = vmatprep.subr.mxu0 %v634_v0 }
  0x89   : > { %465 = vmatpush3.msra.mxu0 %v254_v7 }
  0x8a   : > { %466 = vmatprep.subr.mxu0 %v634_v0 }
  0x8b   : > { %467 = vmatpush3.msra.mxu0 %v253_v9 }
  0x8c   : > { %468 = vmatprep.subr.mxu0 %v634_v0 }
  0x8d   : > { %469 = vmatpush3.msra.mxu0 %v252_v10 }
  0x8e   : > { %470 = vmatprep.subr.mxu0 %v634_v0 }
  0x8f   : > { %471 = vmatpush3.msra.mxu0 %v251_v12 }
  0x90   : > { %472 = vmatprep.subr.mxu0 %v634_v0 }
  0x91   : > { %473 = vmatpush3.msra.mxu0 %v250_v13 }
  0x92   : > { %474 = vmatprep.subr.mxu0 %v634_v0 }
  0x93   : > { %475 = vmatpush3.msra.mxu0 %v249_v14 }
  0x94   : > { %476 = vmatprep.subr.mxu0 %v634_v0 }
  0x95   : > { %477 = vmatpush3.msra.mxu0 %v248_v11 }
  0x96   : > { %478 = vmatprep.subr.mxu0 %v634_v0 }
  0x97   : > { %479 = vmatpush3.msra.mxu0 %v247_v8 }
  0x98   : > { %481 = vmatmul.mubr.f32.vlgmr.msra.gmra.mxu0 %v263_v4 }
 0x158   : > { %v330_v1 = vpop.f32.mrf.mxu0 }
 0x159   : > { %334 = vst [vmem:[%s188_s9] sm:$0xff] %v330_v1 }
 0x15a   : > { %v482_v2 = vpop.f32.mrf.mxu0 }
 0x15b   : > { %577 = shalt.err (!%p574_p10)
}
 0x15c   : > { %s578_s4 = scalar_lea.hbm %s852_s23, 128  ;;  %s582_s11 = scalar_lea.hbm %s896_s3, 256 }
 0x15d   : > { %p579_p1 = scmp.ne.s32.totalorder %s852_s23, %s578_s4  ;;  %p583_p0 = scmp.lt.s32.totalorder %s852_s23, %s896_s3 }
 0x15e   : > { %p584_p2 = scmp.lt.s32.totalorder %s582_s11, %s578_s4 }
 0x15f   : > { %p580_p3 = pnand %p579_p1, %p906_p12 }
 0x160   : > { %p585_p6 = por %p584_p2, %p583_p0 }
 0x161   : > { %p581_p9 = pneg %p580_p3 }
 0x163   : > { %p586_p11 = pnand %p585_p6, %p581_p9 }
 0x165   : > { %589 = shalt.err (!%p586_p11)
}
 0x166   : > { %485 = dma.vmem_to_hbm [thread:$0]  (%p906_p12), %s847_s13, 128, %s852_s23, %s336_s27  }
 0x167 PF: > { %s361_s5 = sand.u32 1, %s616_s14   ;;  %p907_p13 = scmp.ne.s32.totalorder %s902_s26, 0 }
 0x168   : > { %p908_p4 = scmp.ge.s32.totalorder %s628_s17, 2  ;;  %s362_s7 = scalar_lea.sflag [#allocation5], %s361_s5 }
 0x16a   : > { %p492_p5 = pnand %p908_p4, %p907_p13 }
 0x16c   : > { %p493_p7 = pneg %p492_p5 }
 0x16e   : > { %611 = dma.done.wait (%p493_p7), %s362_s7, 128  }
 0x16f   : > { %613 = vsyncadd (%p493_p7), %s362_s7, 4294967168  ;;  %p17_p8 = scmp.ge.s32.totalorder %s685_s19, 4   ;;  %s909_s14 = smov %s620_s15 }
 0x170   : > { %s910_s15 = smov %s624_s16  ;;  %s911_s16 = smov %s697_s22 }
 0x171   : > { %s912_s17 = smov %s685_s19  ;;  %19 = sbr.rel (!%p17_p8) target bundleno = 7 (0x7), region = 77 }
 0x176   :  { %367 = vsyncpa [#allocation4], 1 }
 0x177   :  { %369 = vsyncpa [#allocation4 + $0x1], 1 }
 0x178   :  { %370 = vsyncpa [#allocation5], 1 }
 0x179   :  { %372 = vsyncpa [#allocation5 + $0x1], 1 }

</bundles_post_ra>
